<compile_context>
chip_gen: v7x
topology: tpu7x:2x2x1
jax: 0.10.0
libtpu: 0.0.40
codegen_flags: <defaults>
</compile_context>

<pallas_src>
import functools

import jax
import jax.numpy as jnp
import numpy as np
from jax.experimental import pallas as pl
from jax.experimental.pallas import tpu as pltpu


def _round_up(x: int, m: int) -> int:
    return (x + m - 1) // m * m


def _pick_tile(dim_padded: int, unit: int, max_tile: int) -> int:
    """Largest multiple of `unit` that is <= max_tile and divides dim_padded."""
    best = unit
    t = unit
    limit = min(max_tile, dim_padded)
    while t <= limit:
        if dim_padded % t == 0:
            best = t
        t += unit
    return best


def _linear_kernel(x_ref, w_ref, b_ref, o_ref, acc_ref):
    # x_ref: (tm, tk)   w_ref: (tk, tn)   b_ref: (1, tn) f32
    # o_ref: (tm, tn)   acc_ref: (tm, tn) f32 scratch, resident across the K axis.
    k = pl.program_id(2)

    @pl.when(k == 0)
    def _init():
        acc_ref[...] = jnp.zeros_like(acc_ref)

    # (K, N) weight layout -> plain jnp.dot, contraction on the sublane axis (no XLU
    # transpose in the inner loop). Accumulate in f32 on the MXU.
    acc_ref[...] += jnp.dot(
        x_ref[...], w_ref[...], preferred_element_type=jnp.float32
    )

    @pl.when(k == pl.num_programs(2) - 1)
    def _finalize():
        # Bias add + downcast only once per output tile (keeps the steady state pure
        # vmatmul + accumulate).
        o_ref[...] = (acc_ref[...] + b_ref[...]).astype(o_ref.dtype)


@functools.partial(jax.jit, static_argnames=("compute_dtype",))
def meta_linear(x, weight, bias, *, compute_dtype=None):
    """Pallas implementation of MetaLinear.forward == F.linear(x, weight, bias).

    x:      (B, K)           activation
    weight: (N, K)           PyTorch nn.Linear layout
    bias:   (N,)
    compute_dtype: optional dtype (e.g. jnp.bfloat16) for the MXU inputs; the
                   accumulator and bias add stay in float32.
    """
    B, K = x.shape
    N, K2 = weight.shape
    assert K == K2, "in_features mismatch"
    out_dtype = x.dtype

    # One-time transpose in the wrapper (weights are static -> amortized): (K, N).
    w_t = weight.T

    # Pad every dim up to a TPU-friendly size, then pick tiles that divide it exactly.
    Mp = _round_up(B, 8)
    Kp = _round_up(K, 128)
    Np = _round_up(N, 128)
    tm = _pick_tile(Mp, 8, 256)
    tk = _pick_tile(Kp, 128, 512)
    tn = _pick_tile(Np, 128, 512)

    x_p = x if (Mp, Kp) == (B, K) else jnp.pad(x, ((0, Mp - B), (0, Kp - K)))
    w_p = w_t if (Kp, Np) == (K, N) else jnp.pad(w_t, ((0, Kp - K), (0, Np - N)))
    b_p = bias if Np == N else jnp.pad(bias, (0, Np - N))
    b2d = b_p.reshape(1, Np).astype(jnp.float32)

    if compute_dtype is not None:
        x_p = x_p.astype(compute_dtype)
        w_p = w_p.astype(compute_dtype)

    grid = (Mp // tm, Np // tn, Kp // tk)

    in_bytes = (
        x_p.size * x_p.dtype.itemsize
        + w_p.size * w_p.dtype.itemsize
        + b2d.size * 4
    )
    out_bytes = Mp * Np * jnp.dtype(out_dtype).itemsize
    cost = pl.CostEstimate(
        flops=2 * B * N * K,
        transcendentals=0,
        bytes_accessed=int(in_bytes + out_bytes),
    )

    out = pl.pallas_call(
        _linear_kernel,
        out_shape=jax.ShapeDtypeStruct((Mp, Np), out_dtype),
        grid=grid,
        in_specs=[
            pl.BlockSpec((tm, tk), lambda i, j, k: (i, k)),   # x tile
            pl.BlockSpec((tk, tn), lambda i, j, k: (k, j)),   # (K, N) weight tile
            pl.BlockSpec((1, tn), lambda i, j, k: (0, j)),    # bias tile (f32)
        ],
        out_specs=pl.BlockSpec((tm, tn), lambda i, j, k: (i, j)),
        scratch_shapes=[pltpu.VMEM((tm, tn), jnp.float32)],
        compiler_params=pltpu.CompilerParams(
            dimension_semantics=("parallel", "parallel", "arbitrary"),
            vmem_limit_bytes=32 * 1024 * 1024,  # fits v5e/v6e/v7x scoped budgets
        ),
        cost_estimate=cost,
    )(x_p, w_p, b2d)

    return out[:B, :N]


if __name__ == "__main__":
    # Shapes consistent with nn.Linear(in_features=32, out_features=64), batch=8.
    batch, in_features, out_features = 8, 32, 64

    key = jax.random.PRNGKey(0)
    kx, kw, kb = jax.random.split(key, 3)

    # Deterministic init mimicking nn.Linear's default uniform(-1/sqrt(K), 1/sqrt(K)).
    bound = 1.0 / np.sqrt(in_features)
    x = jax.random.normal(kx, (batch, in_features), dtype=jnp.float32)
    weight = jax.random.uniform(
        kw, (out_features, in_features), minval=-bound, maxval=bound, dtype=jnp.float32
    )
    bias = jax.random.uniform(
        kb, (out_features,), minval=-bound, maxval=bound, dtype=jnp.float32
    )

    # Full-precision reference computed on host (numpy) to avoid TPU default-precision dots.
    y_ref = np.asarray(x) @ np.asarray(weight).T + np.asarray(bias)

    # 1) f32 path, toy shape (single tile after padding).
    y = jax.block_until_ready(meta_linear(x, weight, bias))
    np.testing.assert_allclose(np.asarray(y), y_ref, rtol=1e-5, atol=1e-5)

    # 2) bf16 MXU-input path (f32 accumulate + f32 bias add), looser tolerance.
    y_bf16 = jax.block_until_ready(meta_linear(x, weight, bias, compute_dtype=jnp.bfloat16))
    np.testing.assert_allclose(np.asarray(y_bf16), y_ref, rtol=2e-2, atol=2e-2)

    # 3) Multi-tile shape exercising the (M, N, K) grid and the K-axis accumulator:
    #    grid = (2, 5, 2) with tm=192, tn=128, tk=384.
    B2, K2_, N2 = 384, 768, 640
    k2x, k2w, k2b = jax.random.split(jax.random.PRNGKey(1), 3)
    bound2 = 1.0 / np.sqrt(K2_)
    x2 = jax.random.normal(k2x, (B2, K2_), dtype=jnp.float32)
    w2 = jax.random.uniform(k2w, (N2, K2_), minval=-bound2, maxval=bound2, dtype=jnp.float32)
    b2 = jax.random.uniform(k2b, (N2,), minval=-bound2, maxval=bound2, dtype=jnp.float32)
    y2 = jax.block_until_ready(meta_linear(x2, w2, b2))
    y2_ref = np.asarray(x2) @ np.asarray(w2).T + np.asarray(b2)
    np.testing.assert_allclose(np.asarray(y2), y2_ref, rtol=1e-2, atol=1e-2)

    print("KERNEL_OK")
</pallas_src>

<mosaic_0001>
module attributes {stable_mosaic.version = 11 : i64} {
  func.func @_linear_kernel(%arg0: i32, %arg1: i32, %arg2: i32, %arg3: memref<8x128xf32, #tpu.memory_space<vmem>>, %arg4: memref<128x128xf32, #tpu.memory_space<vmem>>, %arg5: memref<1x128xf32, #tpu.memory_space<vmem>>, %arg6: memref<8x128xf32, #tpu.memory_space<vmem>>, %arg7: memref<8x128xf32, #tpu.memory_space<vmem>>) attributes {dimension_semantics = [#tpu.dimension_semantics<parallel>, #tpu.dimension_semantics<parallel>, #tpu.dimension_semantics<arbitrary>], iteration_bounds = array<i64: 1, 1, 1>, scalar_prefetch = 0 : i64, scratch_operands = 1 : i64, tpu.core_type = #tpu.core_type<tc>, window_params = [{transform_indices = @transform_0, window_bounds = array<i64: 8, 128>}, {transform_indices = @transform_1, window_bounds = array<i64: 128, 128>}, {transform_indices = @transform_2, window_bounds = array<i64: 1, 128>}, {transform_indices = @transform_3, window_bounds = array<i64: 8, 128>}]} {
    %c0_i32 = arith.constant 0 : i32
    %0 = arith.cmpi eq, %arg2, %c0_i32 : i32
    %1 = arith.extui %0 : i1 to i32
    %c0_i32_0 = arith.constant 0 : i32
    %2 = arith.cmpi ne, %1, %c0_i32_0 : i32
    scf.if %2 {
      %cst_10 = arith.constant 0.000000e+00 : f32
      %12 = vector.broadcast %cst_10 : f32 to vector<8x128xf32>
      %c0_11 = arith.constant 0 : index
      %c0_12 = arith.constant 0 : index
      %13 = vector.load %arg7[%c0_11, %c0_12] : memref<8x128xf32, #tpu.memory_space<vmem>>, vector<8x128xf32>
      tpu.vector_store %arg7[%c0_11, %c0_12], %12 {strides = array<i32>} : memref<8x128xf32, #tpu.memory_space<vmem>>, vector<8x128xf32>,
    } else {
    }
    %c0 = arith.constant 0 : index
    %c0_1 = arith.constant 0 : index
    %3 = vector.load %arg7[%c0, %c0_1] : memref<8x128xf32, #tpu.memory_space<vmem>>, vector<8x128xf32>
    %c0_2 = arith.constant 0 : index
    %c0_3 = arith.constant 0 : index
    %4 = vector.load %arg3[%c0_2, %c0_3] : memref<8x128xf32, #tpu.memory_space<vmem>>, vector<8x128xf32>
    %c0_4 = arith.constant 0 : index
    %c0_5 = arith.constant 0 : index
    %5 = vector.load %arg4[%c0_4, %c0_5] : memref<128x128xf32, #tpu.memory_space<vmem>>, vector<128x128xf32>
    %cst = arith.constant dense<0.000000e+00> : vector<8x128xf32>
    %6 = tpu.matmul %4, %5, %cst {dimension_numbers = #tpu.dot_dimension_numbers<[1], [0], [0], [1], [0, 0, 1, 1], [], []>} : vector<8x128xf32>, vector<128x128xf32>, vector<8x128xf32> -> vector<8x128xf32>
    %7 = arith.addf %3, %6 : vector<8x128xf32>
    %c0_6 = arith.constant 0 : index
    %c0_7 = arith.constant 0 : index
    %8 = vector.load %arg7[%c0_6, %c0_7] : memref<8x128xf32, #tpu.memory_space<vmem>>, vector<8x128xf32>
    tpu.vector_store %arg7[%c0_6, %c0_7], %7 {strides = array<i32>} : memref<8x128xf32, #tpu.memory_space<vmem>>, vector<8x128xf32>,
    %c0_i32_8 = arith.constant 0 : i32
    %9 = arith.cmpi eq, %arg2, %c0_i32_8 : i32
    %10 = arith.extui %9 : i1 to i32
    %c0_i32_9 = arith.constant 0 : i32
    %11 = arith.cmpi ne, %10, %c0_i32_9 : i32
    scf.if %11 {
      %c0_10 = arith.constant 0 : index
      %c0_11 = arith.constant 0 : index
      %12 = vector.load %arg7[%c0_10, %c0_11] : memref<8x128xf32, #tpu.memory_space<vmem>>, vector<8x128xf32>
      %c0_12 = arith.constant 0 : index
      %c0_13 = arith.constant 0 : index
      %13 = vector.load %arg5[%c0_12, %c0_13] : memref<1x128xf32, #tpu.memory_space<vmem>>, vector<1x128xf32>
      %14 = vector.broadcast %13 : vector<1x128xf32> to vector<8x128xf32>
      %15 = arith.addf %12, %14 : vector<8x128xf32>
      %c0_14 = arith.constant 0 : index
      %c0_15 = arith.constant 0 : index
      %16 = vector.load %arg6[%c0_14, %c0_15] : memref<8x128xf32, #tpu.memory_space<vmem>>, vector<8x128xf32>
      tpu.vector_store %arg6[%c0_14, %c0_15], %15 {strides = array<i32>} : memref<8x128xf32, #tpu.memory_space<vmem>>, vector<8x128xf32>,
    } else {
    }
    return
  }
  func.func @transform_0(%arg0: i32, %arg1: i32, %arg2: i32) -> (i32, i32) {
    %c0_i32 = arith.constant 0 : i32
    return %arg0, %arg2 : i32, i32
  }
  func.func @transform_1(%arg0: i32, %arg1: i32, %arg2: i32) -> (i32, i32) {
    %c0_i32 = arith.constant 0 : i32
    return %arg2, %arg1 : i32, i32
  }
  func.func @transform_2(%arg0: i32, %arg1: i32, %arg2: i32) -> (i32, i32) {
    %c0_i32 = arith.constant 0 : i32
    %c0_i32_0 = arith.constant 0 : i32
    return %c0_i32, %arg1 : i32, i32
  }
  func.func @transform_3(%arg0: i32, %arg1: i32, %arg2: i32) -> (i32, i32) {
    %c0_i32 = arith.constant 0 : i32
    return %arg0, %arg1 : i32, i32
  }
}

</mosaic_0001>

<bundles_post_ra>
// kernel: meta_linear.1
= control target key start
LH: loop header
LB: loop body
LE: loop exit
PB: predicated region body
PF: predicated region fallthrough
CT: control target
= control target key end

     0   :  { %v242_v3 = vmov 0.0|0.0   ;;  %vm243_vm0 = vmmov 0   ;;  %v244_v6 = vmov 0.0   ;;  %s332_s0 = inlined_call_operand.vmem [shape: f32[8,128], index: 0, kind: input, shape index: {}]   ;;  %s333_s1 = inlined_call_operand.vmem [shape: f32[128,128], index: 1, kind: input, shape index: {}]   ;;  %s334_s2 = inlined_call_operand.vmem [shape: f32[1,128], index: 2, kind: input, shape index: {}]   ;;  %s335_s3 = inlined_call_operand.hbm [shape: f32[8,128], index: 3, kind: output, shape index: {}]  }
   0x1   :  { %v22_v0 = vld [vmem:[%s333_s1] sm:$0xff]  ;;  %v23_v1 = vld [vmem:[%s333_s1 + $0x8] sm:$0xff]  ;;  %v24_v2 = vld [vmem:[%s333_s1 + $0x10] sm:$0xff]  ;;  %190 = vmatprep.subr.bf16.mxu0 %v242_v3  ;;  %187 = vmatprep.mubr.msk.f32.mxu0 %vm243_vm0, %v244_v6 }
   0x2   :  { %v191_v4 = vpack.c.bf16 %v23_v1, %v22_v0  ;;  %v25_v5 = vld [vmem:[%s333_s1 + $0x18] sm:$0xff]  ;;  %v26_v8 = vld [vmem:[%s333_s1 + $0x20] sm:$0xff]  ;;  %v27_v9 = vld [vmem:[%s333_s1 + $0x28] sm:$0xff] }
   0x3   :  { %v194_v7 = vpack.c.bf16 %v25_v5, %v24_v2 }
   0x4   :  { %192 = vmatpush3.bf16.msra.mxu0 %v191_v4 }
   0x5   :  { %193 = vmatprep.subr.bf16.mxu0 %v242_v3 }
   0x6   :  { %8 = vsyncpa [#allocation4], 0  ;;  %v197_v10 = vpack.c.bf16 %v27_v9, %v26_v8  ;;  %v28_v11 = vld [vmem:[%s333_s1 + $0x30] sm:$0xff]  ;;  %v29_v12 = vld [vmem:[%s333_s1 + $0x38] sm:$0xff]  ;;  %s245_s21 = smov [#allocation3]  }
   0x7   :  { %v200_v13 = vpack.c.bf16 %v29_v12, %v28_v11  ;;  %v30_v14 = vld [vmem:[%s333_s1 + $0x40] sm:$0xff]  ;;  %v31_v15 = vld [vmem:[%s333_s1 + $0x48] sm:$0xff]  ;;  %v32_v17 = vld [vmem:[%s333_s1 + $0x50] sm:$0xff]  ;;  %s129_s22 = sshll.u32 %s245_s21, 4  ;;  %s130_s22 = int_to_ptr.vmem [resolvable:$true] %s129_s22 }
   0x8   :  { %195 = vmatpush3.bf16.msra.mxu0 %v194_v7  ;;  %v203_v16 = vpack.c.bf16 %v31_v15, %v30_v14  ;;  %v33_v18 = vld [vmem:[%s333_s1 + $0x58] sm:$0xff]  ;;  %v34_v20 = vld [vmem:[%s333_s1 + $0x60] sm:$0xff]  ;;  %v35_v21 = vld [vmem:[%s333_s1 + $0x68] sm:$0xff]  ;;  %p223_p1 = scmp.lt.s32.totalorder %s130_s22, %s130_s22 }
   0x9   :  { %196 = vmatprep.subr.bf16.mxu0 %v242_v3  ;;  %v206_v19 = vpack.c.bf16 %v33_v18, %v32_v17  ;;  %v209_v22 = vpack.c.bf16 %v35_v21, %v34_v20  ;;  %v36_v23 = vld [vmem:[%s333_s1 + $0x70] sm:$0xff]  ;;  %v37_v24 = vld [vmem:[%s333_s1 + $0x78] sm:$0xff]  ;;  %v21_v26 = vld [vmem:[%s332_s0] sm:$0xff]  ;;  %s218_s1 = scalar_lea.vmem %s130_s22, 128 }
   0xa   :  { %v212_v25 = vpack.c.bf16 %v37_v24, %v36_v23  ;;  %v137_v27 = vld [vmem:[%s334_s2] ss:$0 sm:$0xff]  ;;  %p219_p0 = scmp.ne.s32.totalorder %s130_s22, %s218_s1  ;;  %p224_p2 = scmp.lt.s32.totalorder %s218_s1, %s218_s1 }
   0xc   :  { %198 = vmatpush3.bf16.msra.mxu0 %v197_v10  ;;  %p225_p3 = por %p224_p2, %p223_p1 }
   0xd   :  { %199 = vmatprep.subr.bf16.mxu0 %v242_v3 }
   0xe   :  { %p226_p4 = pnand %p225_p3, %p219_p0 }
  0x10   :  { %201 = vmatpush3.bf16.msra.mxu0 %v200_v13 }
  0x11   :  { %202 = vmatprep.subr.bf16.mxu0 %v242_v3 }
  0x14   :  { %204 = vmatpush3.bf16.msra.mxu0 %v203_v16 }
  0x15   :  { %205 = vmatprep.subr.bf16.mxu0 %v242_v3 }
  0x18   :  { %207 = vmatpush3.bf16.msra.mxu0 %v206_v19 }
  0x19   :  { %208 = vmatprep.subr.bf16.mxu0 %v242_v3 }
  0x1c   :  { %210 = vmatpush3.bf16.msra.mxu0 %v209_v22 }
  0x1d   :  { %211 = vmatprep.subr.bf16.mxu0 %v242_v3 }
  0x20   :  { %213 = vmatpush3.bf16.msra.mxu0 %v212_v25 }
  0x23   :  { %188 = vmatmul.mubr.f32.vlgmr.msra.gmra.mrb[0].mxu0 %v21_v26 }
  0xf6   :  { %v104_v28 = vpop.f32.mrb[0].mxu0 }
  0xf7   :  { %v121_v29 = vadd.f32 %v137_v27, %v104_v28  ;;  %v189_v30 = vpop.f32.mrb[1].mxu0 }
  0xf9   :  { %122 = vst [vmem:[#allocation3] sm:$0xff] %v121_v29 }
  0xfa   :  { %229 = shalt.err (!%p226_p4)
}
  0xfb   :  { %s230_s24 = scalar_lea.hbm %s335_s3, 128 }
  0xfc   :  { %p231_p5 = scmp.ne.s32.totalorder %s335_s3, %s230_s24  ;;  %p234_p6 = scmp.lt.u32.totalorder %s230_s24, %s335_s3 }
  0xfe   :  { %p236_p7 = pnand %p234_p6, %p231_p5 }
 0x100   :  { %239 = shalt.err (!%p236_p7)
}
 0x101   :  { %132 = dma.vmem_to_hbm [thread:$0]  %s130_s22, 128, %s335_s3, [#allocation4]  }
 0x102   :  { %240 = dma.done.wait [#allocation4], 128  }
 0x103   :  { %241 = vsyncadd [#allocation4], 4294967168 }
 0x104   :  { %136 = vsyncpa [#allocation4], 1 }

</bundles_post_ra>
